<compile_context>
chip_gen: v5e
topology: v5e:2x2
jax: 0.10.0
libtpu: 0.0.40
codegen_flags: <defaults>
</compile_context>

<pallas_src>
import functools

import jax
import jax.numpy as jnp
from jax import lax
from jax.experimental import pallas as pl
from jax.experimental.pallas import tpu as pltpu

_LANES = 128
_SUBLANES = 8


def _per_input_tile_budget_bytes():
    # 2-4 MiB per input tile: big enough to amortize per-grid-step overhead,
    # small enough that 2 inputs x 2 pipeline buffers (+ output + temporaries)
    # stay well inside the scoped-VMEM limit on every generation
    # (v7x only has 64 MiB VMEM per TensorCore, 32 MiB default scoped).
    try:
        vmem = getattr(pltpu.get_tpu_info(), "vmem_capacity_bytes", None)
        if vmem is not None and vmem <= (64 << 20):
            return 2 << 20  # v7x
    except Exception:
        pass
    return 4 << 20  # v5e / v6e (128 MiB physical VMEM)


def _select_tiling(R, C, itemsize):
    """Pick (tile_r, chunk_r): row-tile size per grid step and rows per inner-loop chunk."""
    C_pad = ((C + _LANES - 1) // _LANES) * _LANES
    if R < _SUBLANES:
        # Tiny input: one full-extent block (exempt from the (8,128) rule).
        return R, R

    vregs_per_8rows = max(1, C_pad // _LANES)
    # Aim for ~8 live data vregs per unrolled loop iteration.
    chunk_r = _SUBLANES * max(1, 8 // vregs_per_8rows)
    chunk_r = min(chunk_r, (R // _SUBLANES) * _SUBLANES)
    chunk_r = max(chunk_r, _SUBLANES)

    budget = _per_input_tile_budget_bytes()
    # NOTE: for extremely large C (one 8-row chunk alone exceeding the budget) a
    # 2-D (row, col) grid would be needed; not handled here.
    rows_by_budget = (budget // (C_pad * itemsize)) // chunk_r * chunk_r
    rows_by_budget = max(chunk_r, rows_by_budget)
    rows_cap = (R // chunk_r) * chunk_r  # largest whole-chunk tile <= R
    tile_r = min(rows_by_budget, rows_cap)

    # Keep >= 2 grid steps so the "parallel" axis can split across TensorCores (v7x).
    if tile_r >= R and R > chunk_r:
        tile_r = max(chunk_r, ((R // 2) // chunk_r) * chunk_r)
    return tile_r, chunk_r


def _bce_tile_kernel(x_ref, y_ref, o_ref, *, tile_r, chunk_r, n_chunks, rows,
                     needs_mask, unroll):
    # x_ref / y_ref: (tile_r, C) row tile of the flattened (B*T, C) inputs.
    # o_ref: (chunk_r, C) per-tile partial sum (summed in the wrapper).
    i = pl.program_id(0)

    def body(c, acc):
        r0 = pl.multiple_of(c * chunk_r, chunk_r)
        x = x_ref[pl.ds(r0, chunk_r), :].astype(jnp.float32)
        y = y_ref[pl.ds(r0, chunk_r), :].astype(jnp.float32)
        # Numerically-stable binary_cross_entropy_with_logits (matches PyTorch):
        #   max(x, 0) - x*y + log1p(exp(-|x|))
        bce = jnp.maximum(x, 0.0) - x * y + jnp.log1p(jnp.exp(-jnp.abs(x)))
        if needs_mask:
            # Ragged trailing tile: rows beyond the array end hold unspecified
            # data; select 0 for them (where-select, NaN-safe).
            row_ids = (i * tile_r + r0
                       + lax.broadcasted_iota(jnp.int32, bce.shape, 0))
            bce = jnp.where(row_ids < rows, bce, 0.0)
        return acc + bce

    acc = lax.fori_loop(0, n_chunks, body,
                        jnp.zeros(o_ref.shape, jnp.float32), unroll=unroll)
    o_ref[...] = acc


def ce_pretrain_loss(encoder_out, labels, time_mask_indices=None):
    """loss = sum_t BCEWithLogits(encoder_out[:, t], labels[:, t], reduction='mean')."""
    # time_mask_indices is accepted for API parity but unused (as in PyTorch).
    B, T, C = encoder_out.shape
    assert labels.shape == (B, T, C)
    R = B * T
    n = R * C

    # Free row-major view; no pad / slice copies of the inputs.
    x2 = encoder_out.reshape(R, C)
    y2 = labels.reshape(R, C)

    itemsize = max(x2.dtype.itemsize, y2.dtype.itemsize)
    tile_r, chunk_r = _select_tiling(R, C, itemsize)
    num_tiles = pl.cdiv(R, tile_r)
    n_chunks = tile_r // chunk_r
    needs_mask = (R % tile_r) != 0
    unroll = True if n_chunks <= 16 else 8

    kernel = functools.partial(
        _bce_tile_kernel, tile_r=tile_r, chunk_r=chunk_r, n_chunks=n_chunks,
        rows=R, needs_mask=needs_mask, unroll=unroll)

    out_rows = num_tiles * chunk_r
    partials = pl.pallas_call(
        kernel,
        out_shape=jax.ShapeDtypeStruct((out_rows, C), jnp.float32),
        grid_spec=pltpu.PrefetchScalarGridSpec(
            num_scalar_prefetch=0,
            grid=(num_tiles,),
            in_specs=[
                pl.BlockSpec((tile_r, C), lambda i: (i, 0)),
                pl.BlockSpec((tile_r, C), lambda i: (i, 0)),
            ],
            out_specs=pl.BlockSpec((chunk_r, C), lambda i: (i, 0)),
        ),
        compiler_params=pltpu.CompilerParams(
            dimension_semantics=("parallel",),
            vmem_limit_bytes=32 * 1024 * 1024,
        ),
        cost_estimate=pl.CostEstimate(
            flops=6 * n,
            transcendentals=2 * n,
            bytes_accessed=n * (x2.dtype.itemsize + y2.dtype.itemsize)
            + out_rows * C * 4,
        ),
    )(x2, y2)

    # sum_t mean_{B,C}(bce) == sum_all(bce) / (B*C); apply 1/(B*C) exactly once.
    return jnp.sum(partials) * (1.0 / float(B * C))


def _reference_loss(encoder_out, labels):
    x = encoder_out.astype(jnp.float32)
    y = labels.astype(jnp.float32)
    bce = jnp.maximum(x, 0.0) - x * y + jnp.log1p(jnp.exp(-jnp.abs(x)))
    # per-frame mean over (B, C), then sum over frames
    return jnp.sum(jnp.mean(bce, axis=(0, 2)))


if __name__ == "__main__":
    key = jax.random.PRNGKey(0)

    shapes = [
        (3, 20, 192),   # 2 row tiles, ragged trailing tile (masked path), C not /128
        (2, 32, 128),   # single clean lane/sublane-dense tile
    ]
    for (B, T, C) in shapes:
        key, k_out, k_lab, k_mask = jax.random.split(key, 4)
        encoder_out = jax.random.normal(k_out, (B, T, C), dtype=jnp.float32)
        # labels are probabilities/targets in [0, 1] for BCE-with-logits
        labels = jax.random.uniform(k_lab, (B, T, C), dtype=jnp.float32)
        # unused by the forward, provided for API parity
        time_mask_indices = jax.random.bernoulli(k_mask, 0.5, (B, T))

        loss = jax.block_until_ready(
            ce_pretrain_loss(encoder_out, labels, time_mask_indices))
        ref = jax.block_until_ready(_reference_loss(encoder_out, labels))
        assert jnp.allclose(loss, ref, rtol=1e-5, atol=1e-5), (B, T, C, loss, ref)

    print("KERNEL_OK")
</pallas_src>

<mosaic_0001>
module attributes {stable_mosaic.version = 11 : i64} {
  func.func @_bce_tile_kernel(%arg0: i32, %arg1: memref<32x192xf32, #tpu.memory_space<vmem>>, %arg2: memref<32x192xf32, #tpu.memory_space<vmem>>, %arg3: memref<32x192xf32, #tpu.memory_space<vmem>>) attributes {dimension_semantics = [#tpu.dimension_semantics<parallel>], iteration_bounds = array<i64: 2>, scalar_prefetch = 0 : i64, scratch_operands = 0 : i64, tpu.core_type = #tpu.core_type<tc>, window_params = [{transform_indices = @transform_0, window_bounds = array<i64: 32, 192>}, {transform_indices = @transform_1, window_bounds = array<i64: 32, 192>}, {transform_indices = @transform_2, window_bounds = array<i64: 32, 192>}]} {
    %cst = arith.constant 0.000000e+00 : f32
    %0 = vector.broadcast %cst : f32 to vector<32x192xf32>
    %c0_i32 = arith.constant 0 : i32
    %c32_i32 = arith.constant 32 : i32
    %1 = arith.muli %c0_i32, %c32_i32 : i32
    %2 = tpu.assume_multiple %1, 32 : i32
    %3 = arith.index_cast %2 : i32 to index
    %c0 = arith.constant 0 : index
    %4 = vector.load %arg1[%3, %c0] : memref<32x192xf32, #tpu.memory_space<vmem>>, vector<32x192xf32>
    %5 = arith.index_cast %2 : i32 to index
    %c0_0 = arith.constant 0 : index
    %6 = vector.load %arg2[%5, %c0_0] : memref<32x192xf32, #tpu.memory_space<vmem>>, vector<32x192xf32>
    %cst_1 = arith.constant 0.000000e+00 : f32
    %7 = vector.broadcast %cst_1 : f32 to vector<32x192xf32>
    %8 = arith.maximumf %4, %7 : vector<32x192xf32>
    %9 = arith.mulf %4, %6 : vector<32x192xf32>
    %10 = arith.subf %8, %9 : vector<32x192xf32>
    %11 = math.absf %4 : vector<32x192xf32>
    %cst_2 = arith.constant 0.000000e+00 : f32
    %12 = vector.broadcast %cst_2 : f32 to vector<32x192xf32>
    %13 = arith.subf %12, %11 : vector<32x192xf32>
    %14 = math.exp %13 : vector<32x192xf32>
    %15 = math.log1p %14 : vector<32x192xf32>
    %16 = arith.addf %10, %15 : vector<32x192xf32>
    %c32_i32_3 = arith.constant 32 : i32
    %17 = arith.muli %arg0, %c32_i32_3 : i32
    %18 = arith.addi %17, %2 : i32
    %19 = tpu.iota {dimensions = array<i32: 0>} : vector<32x192xi32>
    %20 = vector.broadcast %18 : i32 to vector<32x192xi32>
    %21 = arith.addi %20, %19 : vector<32x192xi32>
    %c60_i32 = arith.constant 60 : i32
    %22 = vector.broadcast %c60_i32 : i32 to vector<32x192xi32>
    %23 = arith.cmpi slt, %21, %22 : vector<32x192xi32>
    %cst_4 = arith.constant 0.000000e+00 : f32
    %24 = vector.broadcast %cst_4 : f32 to vector<32x192xf32>
    %25 = arith.select %23, %16, %24 : vector<32x192xi1>, vector<32x192xf32>
    %26 = arith.addf %0, %25 : vector<32x192xf32>
    %c1_i32 = arith.constant 1 : i32
    %c0_5 = arith.constant 0 : index
    %c0_6 = arith.constant 0 : index
    %27 = vector.load %arg3[%c0_5, %c0_6] : memref<32x192xf32, #tpu.memory_space<vmem>>, vector<32x192xf32>
    tpu.vector_store %arg3[%c0_5, %c0_6], %26 {strides = array<i32>} : memref<32x192xf32, #tpu.memory_space<vmem>>, vector<32x192xf32>,
    return
  }
  func.func @transform_0(%arg0: i32) -> (i32, i32) {
    %c0_i32 = arith.constant 0 : i32
    %c0_i32_0 = arith.constant 0 : i32
    return %arg0, %c0_i32 : i32, i32
  }
  func.func @transform_1(%arg0: i32) -> (i32, i32) {
    %c0_i32 = arith.constant 0 : i32
    %c0_i32_0 = arith.constant 0 : i32
    return %arg0, %c0_i32 : i32, i32
  }
  func.func @transform_2(%arg0: i32) -> (i32, i32) {
    %c0_i32 = arith.constant 0 : i32
    %c0_i32_0 = arith.constant 0 : i32
    return %arg0, %c0_i32 : i32, i32
  }
}

</mosaic_0001>

<bundles_post_ra>
// kernel: tpu_custom_call.1
= control target key start
LH: loop header
LB: loop body
LE: loop exit
PB: predicated region body
PF: predicated region fallthrough
CT: control target
= control target key end

     0   :  { %7 = vsyncpa [#allocation3], 0  ;;  %s1094_s0 = inlined_call_operand.hbm [shape: f32[60,192], index: 0, kind: input, shape index: {}]   ;;  %s1095_s1 = inlined_call_operand.hbm [shape: f32[60,192], index: 1, kind: input, shape index: {}]   ;;  %s1096_s2 = inlined_call_operand.hbm [shape: f32[64,192], index: 2, kind: output, shape index: {}]  }
   0x1   :  { %9 = vsyncpa [#allocation3 + $0x1], 0 }
   0x2   :  { %10 = vsyncpa [#allocation6], 0 }
   0x3   :  { %12 = vsyncpa [#allocation6 + $0x1], 0 }
   0x4   :  { %13 = vsyncpa [#allocation4], 0 }
   0x5   :  { %15 = vsyncpa [#allocation4 + $0x1], 0  ;;  %s788_s9 = smov 0   ;;  %s790_s10 = smov 0  }
   0x6   :  { %s792_s11 = smov 0   ;;  %s794_s12 = smov 0  }
   0x7 LB: > { %s809_s13 = sadd.s32 4294967295, %s767_s12   ;;  %s522_s14 = sadd.s32 4294967294, %s767_s12   ;;  %s767_s12 = sphi %s794_s12, %s1117_s12   ;;  %s763_s11 = sphi %s792_s11, %s1116_s11   ;;  %s759_s10 = sphi %s790_s10, %s1115_s10   ;;  %s755_s9 = sphi %s788_s9, %s1114_s9  }
   0x8   : > { %s813_s15 = sadd.s32 1, %s767_s12   ;;  %s28_s16 = sadd.s32 1, %s763_s11 }
   0x9   : > { %s25_s17 = ssub.s32 %s767_s12, %s813_s15  ;;  %p35_p0 = scmp.ne.s32.totalorder %s763_s11, %s759_s10 }
   0xa   : > { %p26_p1 = scmp.eq.s32.totalorder %s25_s17, 0  ;;  %p36_p2 = scmp.eq.s32.totalorder %s767_s12, 0 }
   0xb   : > { %p41_p3 = scmp.ne.s32.totalorder %s759_s10, %s755_s9  ;;  %p42_p4 = scmp.eq.s32.totalorder %s809_s13, 0 }
   0xc   : > { %s825_s18 = scalar_select %p26_p1, %s763_s11, %s28_s16  }
   0xd   : > { %p827_p5 = por %p36_p2, %p35_p0  ;;  %p831_p6 = por %p42_p4, %p41_p3 }
   0xe   : > { %p91_p7 = scmp.eq.s32.totalorder %s809_s13, 1  ;;  %p97_p8 = scmp.eq.s32.totalorder %s522_s14, 1 }
   0xf   : > { %p567_p10 = scmp.lt.s32.totalorder %s767_s12, 2  ;;  %s847_s23 = sand.u32 1, %s763_s11  }
  0x10   : > { %p838_p11 = por %p91_p7, %p35_p0  ;;  %p842_p12 = por %p97_p8, %p41_p3 }
  0x11   : > { %s545_s24 = sshll.u32 %s767_s12, 6  ;;  %s525_s25 = sshll.u32 %s847_s23, 6 }
  0x12   : > { %s127_s28 = scalar_lea.hbm %s1094_s0, %s545_s24  ;;  %s121_s30 = scalar_lea.vmem [#allocation2], %s525_s25 }
  0x13   : > { %s128_s29 = sshll.u32 %s127_s28, 4  ;;  %s130_s3 = sshll.u32 %s121_s30, 4  ;;  %s129_s29 = int_to_ptr.hbm [resolvable:$true] %s128_s29  ;;  %s131_s3 = int_to_ptr.vmem [resolvable:$true] %s130_s3 }
  0x14   : > { %p860_p13 = pnand %p567_p10, %p827_p5  ;;  %p533_p0 = scmp.ge.s32.totalorder %s767_s12, 1 }
  0x15   : > { %p161_p1 = scmp.lt.s32.totalorder %s767_s12, 3  ;;  %s118_s5 = scalar_lea.sflag [#allocation3], %s847_s23 }
  0x16   : > { %s637_s6 = sshra.s32 %s129_s29, 4  ;;  %p641_p3 = pneg %p860_p13  ;;  %s638_s6 = int_to_ptr.hbm [resolvable:$true] %s637_s6 }
  0x17   : > { %s639_s7 = scalar_lea.hbm %s638_s6, 64  ;;  %s644_s16 = scalar_lea.hbm %s1094_s0, 128 }
  0x18   : > { %p640_p2 = scmp.ne.s32.totalorder %s638_s6, %s639_s7  ;;  %p645_p5 = scmp.lt.s32.totalorder %s638_s6, %s1094_s0 }
  0x19   : > { %p646_p8 = scmp.lt.s32.totalorder %s644_s16, %s639_s7 }
  0x1a   : > { %p642_p4 = pnand %p641_p3, %p640_p2 }
  0x1b   : > { %p647_p10 = por %p646_p8, %p645_p5 }
  0x1c   : > { %p643_p7 = pneg %p642_p4 }
  0x1e   : > { %p648_p9 = pnand %p647_p10, %p643_p7 }
  0x20   : > { %651 = shalt.err (!%p648_p9)
}
  0x21   : > { %s769_s26 = smov 256   ;;  %s770_s27 = smov 16  }
  0x22   : > { %559 = dma.hbm_to_vmem [thread:$0]  (!%p860_p13), %s129_s29, 1024, %s131_s3, %s118_s5, %s769_s26, %s769_s26, %s770_s27  }
  0x23   : > { %p884_p2 = pnand %p533_p0, %p161_p1  ;;  %s150_s7 = scalar_lea.hbm %s1095_s1, %s545_s24 }
  0x24   : > { %s151_s8 = sshll.u32 %s150_s7, 4  ;;  %s144_s14 = scalar_lea.vmem [#allocation5], %s525_s25  ;;  %s152_s8 = int_to_ptr.hbm [resolvable:$true] %s151_s8 }
  0x25   : > { %s153_s16 = sshll.u32 %s144_s14, 4  ;;  %s141_s17 = scalar_lea.sflag [#allocation6], %s847_s23  ;;  %s154_s16 = int_to_ptr.vmem [resolvable:$true] %s153_s16 }
  0x26   : > { %s667_s19 = sshra.s32 %s152_s8, 4  ;;  %s674_s30 = scalar_lea.hbm %s1095_s1, 128  ;;  %s668_s19 = int_to_ptr.hbm [resolvable:$true] %s667_s19 }
  0x27   : > { %s669_s29 = scalar_lea.hbm %s668_s19, 64  ;;  %p675_p4 = scmp.lt.s32.totalorder %s668_s19, %s1095_s1 }
  0x28   : > { %p670_p9 = scmp.ne.s32.totalorder %s668_s19, %s669_s29  ;;  %p676_p7 = scmp.lt.s32.totalorder %s674_s30, %s669_s29 }
  0x2a   : > { %p672_p0 = pnand %p670_p9, %p641_p3  ;;  %p677_p5 = por %p676_p7, %p675_p4 }
  0x2c   : > { %p673_p1 = pneg %p672_p0 }
  0x2e   : > { %p678_p8 = pnand %p677_p5, %p673_p1 }
  0x30   : > { %681 = shalt.err (!%p678_p8)
}
  0x31   : > { %562 = dma.hbm_to_vmem [thread:$0]  (!%p860_p13), %s152_s8, 1024, %s154_s16, %s141_s17, %s769_s26, %s769_s26, %s770_s27  }
  0x32   : > { %165 = sbr.rel (%p884_p2) target bundleno = 110 (0x6e), region = 28  ;;  %s910_s23 = sand.u32 (!%p884_p2), 1, %s759_s10  }
  0x33   : > { %s913_s25 = sshll.u32 (!%p884_p2), %s910_s23, 6  ;;  %s168_s7 = scalar_lea.sflag (!%p884_p2), [#allocation3], %s910_s23 }
  0x34   : > { %s917_s14 = scalar_lea.vmem (!%p884_p2), [#allocation2], %s913_s25 }
  0x37   : > { %742 = dma.done.wait (%p831_p6), %s168_s7, 1024  }
  0x38   : > { %744 = vsyncadd (%p831_p6), %s168_s7, 4294966272  ;;  %s178_s4 = scalar_lea.sflag [#allocation6], %s910_s23  ;;  %s925_s26 = scalar_lea.vmem [#allocation5], %s913_s25 }
  0x39   : > { %746 = dma.done.wait (%p831_p6), %s178_s4, 1024  }
  0x3a   : > { %748 = vsyncadd (%p831_p6), %s178_s4, 4294966272  ;;  %v370_v0 = vlaneseq  ;;  %v214_v1 = vld [vmem:[%s917_s14] sm:$0xff]  ;;  %v215_v3 = vld [vmem:[%s917_s14 + $0x8] sm:$0xff]  ;;  %s537_s20 = sshll.u32 %s809_s13, 5  ;;  %vm401_vm1 = vcmask 523264   ;;  %s1017_s27 = scalar_lea.vmem [#allocation7], %s913_s25 }
  0x3b   : > { %v256_v4 = vand.u32 2147483647, %v214_v1  ;;  %v216_v5 = vld [vmem:[%s917_s14 + $0x10] sm:$0xff]  ;;  %v257_v6 = vand.u32 2147483647, %v215_v3  ;;  %v217_v9 = vld [vmem:[%s917_s14 + $0x18] sm:$0xff]  ;;  %v945_v20 = vstv %s537_s20 }
  0x3c   : > { %v932_v2 = vshrl.u32 %v370_v0, 7  ;;  %v258_v7 = vand.u32 2147483647, %v216_v5  ;;  %v224_v10 = vld [vmem:[%s925_s26] sm:$0xff]  ;;  %v225_v16 = vld [vmem:[%s925_s26 + $0x8] sm:$0xff]  ;;  %v232_v19 = vmax.f32 %v214_v1, 0.0 }
  0x3d   : > { %v264_v8 = vsub.f32 0.0, %v256_v4  ;;  %v265_v11 = vsub.f32 0.0, %v257_v6  ;;  %v941_v14 = vld [vmem:[%s917_s14 + $0x20] sm:$0xff]  ;;  %v259_v17 = vand.u32 2147483647, %v217_v9  ;;  %v226_v22 = vld [vmem:[%s925_s26 + $0x10] sm:$0xff]  ;;  %v240_v24 = vmul.f32 %v224_v10, %v214_v1 }
  0x3e   : > { %v266_v12 = vsub.f32 0.0, %v258_v7  ;;  %v372_v13 = vadd.s32 8, %v932_v2  ;;  %v373_v18 = vadd.s32 16, %v932_v2  ;;  %v260_v26 = vand.u32 2147483647, %v941_v14  ;;  %v227_v30 = vld [vmem:[%s925_s26 + $0x18] sm:$0xff] }
  0x3f   : > { %v272_v15 = vmul.f32 1.442695, %v264_v8  ;;  %v274_v21 = vmul.f32 1.442695, %v265_v11  ;;  %v267_v25 = vsub.f32 0.0, %v259_v17  ;;  %v233_v27 = vmax.f32 %v215_v3, 0.0 }
  0x40   : > { %v276_v23 = vmul.f32 1.442695, %v266_v12  ;;  %v241_v28 = vmul.f32 %v225_v16, %v215_v3  ;;  %v234_v29 = vmax.f32 %v216_v5, 0.0  ;;  %v951_v31 = vld [vmem:[%s917_s14 + $0x28] sm:$0xff]  ;;  %v242_v32 = vmul.f32 %v226_v22, %v216_v5  ;;  %v954_v35 = vld [vmem:[%s917_s14 + $0x30] sm:$0xff]  ;;  %v228_v38 = vld [vmem:[%s925_s26 + $0x20] sm:$0xff] }
  0x41   : > { %605 = vpow2.f32 %v272_v15  ;;  %v278_v33 = vmul.f32 1.442695, %v267_v25  ;;  %v268_v34 = vsub.f32 0.0, %v260_v26  ;;  %v235_v36 = vmax.f32 %v217_v9, 0.0  ;;  %v980_v62 = vld [vmem:[%s917_s14 + $0x38] sm:$0xff]  ;;  %s549_s28 = sshll.u32 %s809_s13, 6 }
  0x42   : > { %607 = vpow2.f32 %v274_v21  ;;  %v243_v37 = vmul.f32 %v227_v30, %v217_v9  ;;  %v261_v40 = vand.u32 2147483647, %v951_v31  ;;  %v960_v41 = vadd.s32 %v945_v20, %v932_v2  ;;  %s422_s17 = scalar_lea.hbm %s1096_s2, %s549_s28  ;;  %s423_s13 = sshll.u32 %s1017_s27, 4  ;;  %s424_s13 = int_to_ptr.vmem [resolvable:$true] %s423_s13 }
  0x43   : > { %609 = vpow2.f32 %v276_v23  ;;  %v280_v39 = vmul.f32 1.442695, %v268_v34  ;;  %v963_v42 = vadd.s32 %v945_v20, %v372_v13  ;;  %v966_v43 = vadd.s32 %v945_v20, %v373_v18  ;;  %s425_s19 = sshll.u32 %s422_s17, 4  ;;  %s410_s29 = scalar_lea.sflag [#allocation4], %s910_s23  ;;  %s426_s19 = int_to_ptr.hbm [resolvable:$true] %s425_s19 }
  0x44   : > { %611 = vpow2.f32 %v278_v33  ;;  %v262_v44 = vand.u32 2147483647, %v954_v35  ;;  %v969_v46 = vsub.f32 %v232_v19, %v240_v24  ;;  %v971_v47 = vsub.f32 %v233_v27, %v241_v28  ;;  %s711_s3 = sshra.s32 %s426_s19, 4  ;;  %s717_s6 = scalar_lea.hbm %s1096_s2, 128  ;;  %s712_s3 = int_to_ptr.hbm [resolvable:$true] %s711_s3 }
  0x45   : > { %v973_v48 = vsub.f32 %v234_v29, %v242_v32  ;;  %613 = vpow2.f32 %v280_v39  ;;  %v236_v52 = vmax.f32 %v941_v14, 0.0  ;;  %v244_v53 = vmul.f32 %v228_v38, %v941_v14  ;;  %s713_s5 = scalar_lea.hbm %s712_s3, 64  ;;  %p718_p10 = scmp.lt.s32.totalorder %s712_s3, %s1096_s2 }
  0x46   : > { %v977_v57 = vsub.f32 %v235_v36, %v243_v37  ;;  %v269_v58 = vsub.f32 0.0, %v261_v40  ;;  %v270_v61 = vsub.f32 0.0, %v262_v44  ;;  %vm380_vm0 = vcmp.lt.s32.totalorder %v960_v41, 60  ;;  %v230_v41 = vld [vmem:[%s925_s26 + $0x30] sm:$0xff]  ;;  %p714_p6 = scmp.ne.s32.totalorder %s712_s3, %s713_s5  ;;  %p719_p2 = scmp.lt.s32.totalorder %s717_s6, %s713_s5 }
  0x47   : > { %v606_v45 = vpop.eup %605  ;;  %vm381_vm2 = vcmp.lt.s32.totalorder %v963_v42, 60  ;;  %v263_v11 = vand.u32 2147483647, %v980_v62  ;;  %v252_v37 = vsub.f32 %v236_v52, %v244_v53  ;;  %vm382_vm8 = vcmp.lt.s32.totalorder %v966_v43, 60 }
  0x48   : > { %v608_v49 = vpop.eup %607  ;;  %v288_v50 = vadd.f32 1.0, %v606_v45  ;;  %v291_v51 = vmul.f32 -0.5, %v606_v45  ;;  %v294_v59 = vand.u32 2147483647, %v606_v45  ;;  %v282_v10 = vmul.f32 1.442695, %v269_v58  ;;  %p715_p13 = pnand %p714_p6, %p838_p11  ;;  %p720_p9 = por %p719_p2, %p718_p10 }
  0x49   : > { %v610_v54 = vpop.eup %609  ;;  %v297_v55 = vadd.f32 1.0, %v608_v49  ;;  %v300_v56 = vmul.f32 -0.5, %v608_v49  ;;  %v303_v1 = vand.u32 2147483647, %v608_v49  ;;  %v284_v14 = vmul.f32 1.442695, %v270_v61 }
  0x4a   : > { %615 = vlog2.f32 %v288_v50  ;;  %v306_v60 = vadd.f32 1.0, %v610_v54  ;;  %v612_v63 = vpop.eup %611  ;;  %v292_v0 = vadd.f32 1.0, %v291_v51  ;;  %v309_v3 = vmul.f32 -0.5, %v610_v54  ;;  %p716_p3 = pneg %p715_p13 }
  0x4b   : > { %617 = vlog2.f32 %v297_v55  ;;  %v301_v4 = vadd.f32 1.0, %v300_v56  ;;  %v312_v5 = vand.u32 2147483647, %v610_v54  ;;  %v315_v6 = vadd.f32 1.0, %v612_v63  ;;  %v614_v7 = vpop.eup %613 }
  0x4c   : > { %619 = vlog2.f32 %v306_v60  ;;  %v310_v8 = vadd.f32 1.0, %v309_v3  ;;  %v318_v9 = vmul.f32 -0.5, %v612_v63  ;;  %v324_v12 = vadd.f32 1.0, %v614_v7  ;;  %p721_p0 = pnand %p720_p9, %p716_p3 }
  0x4d   : > { %621 = vlog2.f32 %v315_v6  ;;  %v327_v13 = vmul.f32 -0.5, %v614_v7  ;;  %v293_v15 = vmul.f32 %v606_v45, %v292_v0  ;;  %vm985_vm3 = vcmp.lt.f32.partialorder %v294_v59, 0.0004427343  ;;  %v229_v59 = vld [vmem:[%s925_s26 + $0x28] sm:$0xff] }
  0x4e   : > { %vm989_vm4 = vcmp.lt.f32.partialorder %v303_v1, 0.0004427343  ;;  %v319_v18 = vadd.f32 1.0, %v318_v9  ;;  %v302_v21 = vmul.f32 %v608_v49, %v301_v4  ;;  %vm993_vm5 = vcmp.lt.f32.partialorder %v312_v5, 0.0004427343 }
  0x4f   : > { %v321_v23 = vand.u32 2147483647, %v612_v63  ;;  %623 = vlog2.f32 %v324_v12  ;;  %v311_v26 = vmul.f32 %v610_v54, %v310_v8  ;;  %v328_v27 = vadd.f32 1.0, %v327_v13 }
  0x50   : > { %v616_v19 = vpop.eup %615  ;;  %625 = vpow2.f32 %v282_v10  ;;  %v330_v30 = vand.u32 2147483647, %v614_v7  ;;  %v271_v32 = vsub.f32 0.0, %v263_v11  ;;  %v320_v36 = vmul.f32 %v612_v63, %v319_v18 }
  0x51   : > { %v618_v24 = vpop.eup %617  ;;  %v290_v25 = vmul.f32 0.6931472, %v616_v19  ;;  %627 = vpow2.f32 %v284_v14  ;;  %vm1002_vm6 = vcmp.lt.f32.partialorder %v321_v23, 0.0004427343  ;;  %v329_v52 = vmul.f32 %v614_v7, %v328_v27  ;;  %v231_v19 = vld [vmem:[%s925_s26 + $0x38] sm:$0xff] }
  0x52   : > { %v620_v28 = vpop.eup %619  ;;  %v299_v29 = vmul.f32 0.6931472, %v618_v24  ;;  %v286_v45 = vmul.f32 1.442695, %v271_v32  ;;  %vm1012_vm7 = vcmp.lt.f32.partialorder %v330_v30, 0.0004427343  ;;  %v245_v9 = vmul.f32 %v229_v59, %v951_v31 }
  0x53   : > { %v296_v33 = vsel %vm985_vm3, %v293_v15, %v290_v25  ;;  %v308_v34 = vmul.f32 0.6931472, %v620_v28  ;;  %v622_v38 = vpop.eup %621  ;;  %v237_v4 = vmax.f32 %v951_v31, 0.0  ;;  %v238_v10 = vmax.f32 %v954_v35, 0.0 }
  0x54   : > { %v360_v39 = vadd.f32 %v296_v33, %v969_v46  ;;  %v305_v40 = vsel %vm989_vm4, %v302_v21, %v299_v29  ;;  %v317_v51 = vmul.f32 0.6931472, %v622_v38  ;;  %629 = vpow2.f32 %v286_v45 }
  0x55   : > { %v361_v49 = vadd.f32 %v305_v40, %v971_v47  ;;  %v314_v50 = vsel %vm993_vm5, %v311_v26, %v308_v34  ;;  %v624_v53 = vpop.eup %623  ;;  %v246_v11 = vmul.f32 %v230_v41, %v954_v35  ;;  %v374_v15 = vadd.s32 24, %v932_v2 }
  0x56   : > { %v384_v46 = vsel %vm380_vm0, %v360_v39, 0.0  ;;  %v362_v54 = vadd.f32 %v314_v50, %v973_v48  ;;  %v626_v56 = vpop.eup %625  ;;  %v323_v58 = vsel %vm1002_vm6, %v320_v36, %v317_v51  ;;  %v326_v48 = vmul.f32 0.6931472, %v624_v53 }
  0x57   : > { %400 = vst [vmem:[%s1017_s27] sm:$0xff] %v384_v46  ;;  %v385_v47 = vsel %vm380_vm0, %v361_v49, 0.0  ;;  %v628_v60 = vpop.eup %627  ;;  %v363_v63 = vadd.f32 %v323_v58, %v977_v57  ;;  %v333_v0 = vadd.f32 1.0, %v626_v56  ;;  %v336_v1 = vmul.f32 -0.5, %v626_v56 }
  0x58   : > { %402 = vst.msk [vmem:[%s1017_s27 + $0x8] sm:$0xff] %vm401_vm1, %v385_v47  ;;  %v386_v61 = vsel %vm381_vm2, %v362_v54, 0.0  ;;  %v332_v3 = vsel %vm1012_vm7, %v329_v52, %v326_v48  ;;  %v342_v5 = vadd.f32 1.0, %v628_v60  ;;  %v345_v6 = vmul.f32 -0.5, %v628_v60 }
  0x59   : > { %403 = vst [vmem:[%s1017_s27 + $0x10] sm:$0xff] %v386_v61  ;;  %v387_v7 = vsel %vm381_vm2, %v363_v63, 0.0  ;;  %v364_v8 = vadd.f32 %v332_v3, %v252_v37  ;;  %631 = vlog2.f32 %v333_v0  ;;  %v337_v57 = vadd.f32 1.0, %v336_v1 }
  0x5a   : > { %404 = vst.msk [vmem:[%s1017_s27 + $0x18] sm:$0xff] %vm401_vm1, %v387_v7  ;;  %633 = vlog2.f32 %v342_v5  ;;  %v630_v12 = vpop.eup %629  ;;  %v339_v14 = vand.u32 2147483647, %v626_v56  ;;  %v346_v42 = vadd.f32 1.0, %v345_v6  ;;  %v348_v31 = vand.u32 2147483647, %v628_v60 }
  0x5b   : > { %v388_v13 = vsel %vm382_vm8, %v364_v8, 0.0  ;;  %v351_v16 = vadd.f32 1.0, %v630_v12  ;;  %v354_v17 = vmul.f32 -0.5, %v630_v12  ;;  %v253_v18 = vsub.f32 %v237_v4, %v245_v9 }
  0x5c   : > { %405 = vst [vmem:[%s1017_s27 + $0x20] sm:$0xff] %v388_v13  ;;  %v338_v21 = vmul.f32 %v626_v56, %v337_v57  ;;  %v254_v22 = vsub.f32 %v238_v10, %v246_v11  ;;  %v239_v35 = vmax.f32 %v980_v62, 0.0  ;;  %vm340_vm9 = vcmp.lt.f32.partialorder %v339_v14, 0.0004427343 }
  0x5d   : > { %635 = vlog2.f32 %v351_v16  ;;  %v347_v24 = vmul.f32 %v628_v60, %v346_v42  ;;  %v379_v25 = vadd.s32 %v945_v20, %v374_v15  ;;  %v355_v26 = vadd.f32 1.0, %v354_v17 }
  0x5e   : > { %vm349_vm10 = vcmp.lt.f32.partialorder %v348_v31, 0.0004427343  ;;  %v247_v28 = vmul.f32 %v231_v19, %v980_v62  ;;  %v357_v29 = vand.u32 2147483647, %v630_v12 }
  0x5f   : > { %v632_v23 = vpop.eup %631  ;;  %vm383_vm11 = vcmp.lt.s32.totalorder %v379_v25, 60  ;;  %v356_v36 = vmul.f32 %v630_v12, %v355_v26 }
  0x60   : > { %v634_v2 = vpop.eup %633  ;;  %v335_v27 = vmul.f32 0.6931472, %v632_v23  ;;  %v255_v38 = vsub.f32 %v239_v35, %v247_v28  ;;  %vm358_vm12 = vcmp.lt.f32.partialorder %v357_v29, 0.0004427343 }
  0x61   : > { %v344_v30 = vmul.f32 0.6931472, %v634_v2 }
  0x62   : > { %v341_v32 = vsel %vm340_vm9, %v338_v21, %v335_v27 }
  0x63   : > { %v365_v33 = vadd.f32 %v341_v32, %v253_v18  ;;  %v350_v34 = vsel %vm349_vm10, %v347_v24, %v344_v30  ;;  %v636_v20 = vpop.eup %635 }
  0x64   : > { %v366_v37 = vadd.f32 %v350_v34, %v254_v22  ;;  %v353_v39 = vmul.f32 0.6931472, %v636_v20 }
  0x65   : > { %v389_v62 = vsel %vm382_vm8, %v365_v33, 0.0 }
  0x66   : > { %406 = vst.msk [vmem:[%s1017_s27 + $0x28] sm:$0xff] %vm401_vm1, %v389_v62  ;;  %v390_v40 = vsel %vm383_vm11, %v366_v37, 0.0  ;;  %v359_v44 = vsel %vm358_vm12, %v356_v36, %v353_v39 }
  0x67   : > { %407 = vst [vmem:[%s1017_s27 + $0x30] sm:$0xff] %v390_v40  ;;  %v367_v45 = vadd.f32 %v359_v44, %v255_v38 }
  0x69   : > { %v391_v49 = vsel %vm383_vm11, %v367_v45, 0.0 }
  0x6a   : > { %408 = vst.msk [vmem:[%s1017_s27 + $0x38] sm:$0xff] %vm401_vm1, %v391_v49 }
  0x6b   : > { %724 = shalt.err (!%p721_p0)
}
  0x6c   : > { %s771_s23 = smov 256   ;;  %s772_s14 = smov 16  }
  0x6d   : > { %554 = dma.vmem_to_hbm [thread:$0]  (%p838_p11), %s424_s13, 1024, %s426_s19, %s410_s29, %s771_s23, %s771_s23, %s772_s14  }
  0x6e PF: > { %s440_s4 = sand.u32 1, %s755_s9   ;;  %p1113_p1 = scmp.ge.s32.totalorder %s767_s12, 2 }
  0x6f   : > { %s441_s26 = scalar_lea.sflag [#allocation4], %s440_s4 }
  0x70   : > { %p564_p4 = pnand %p1113_p1, %p842_p12 }
  0x72   : > { %p565_p7 = pneg %p564_p4 }
  0x74   : > { %750 = dma.done.wait (%p565_p7), %s441_s26, 1024  }
  0x75   : > { %752 = vsyncadd (%p565_p7), %s441_s26, 4294966272  ;;  %p18_p5 = scmp.ge.s32.totalorder %s813_s15, 4   ;;  %s1114_s9 = smov %s759_s10 }
  0x76   : > { %s1115_s10 = smov %s763_s11  ;;  %s1116_s11 = smov %s825_s18 }
  0x77   : > { %s1117_s12 = smov %s813_s15  ;;  %20 = sbr.rel (!%p18_p5) target bundleno = 7 (0x7), region = 88 }
  0x7c   :  { %447 = vsyncpa [#allocation3], 1 }
  0x7d   :  { %449 = vsyncpa [#allocation3 + $0x1], 1 }
  0x7e   :  { %450 = vsyncpa [#allocation6], 1 }
  0x7f   :  { %452 = vsyncpa [#allocation6 + $0x1], 1 }
  0x80   :  { %453 = vsyncpa [#allocation4], 1 }
  0x81   :  { %455 = vsyncpa [#allocation4 + $0x1], 1 }

</bundles_post_ra>
